<compile_context>
chip_gen: v5e
topology: v5e:2x2
jax: 0.10.0
libtpu: 0.0.40
codegen_flags: <defaults>
</compile_context>

<pallas_src>
import functools

import jax
import jax.numpy as jnp
from jax import lax
from jax.experimental import pallas as pl
from jax.experimental.pallas import tpu as pltpu


def _loss_basic_partial_kernel(pred_ref, gt_ref, sq_ref, gd_ref, *, img_h, l1):
    """One grid step = one (batch, burst-frame) pair.

    pred_ref : (1, 1, C*H, W)  prediction slab (channels stacked on sublanes)
    gt_ref   : (1,    C*H, W)  ground-truth slab (block index constant over N)
    sq_ref   : (1, 1, 8, 128)  sum((pred - gt)^2)              (scalar, bcast)
    gd_ref   : (1, 1, 8, 128)  sum(|grad(pred) - grad(gt)|)    (scalar, bcast)
    """
    p = pred_ref[0, 0].astype(jnp.float32)   # (C*H, W)
    g = gt_ref[0].astype(jnp.float32)        # (C*H, W)
    rows, cols = p.shape

    # Boundary masks: computed once, shared by both gradient evaluations.
    row = lax.broadcasted_iota(jnp.int32, (rows, cols), 0)
    col = lax.broadcasted_iota(jnp.int32, (rows, cols), 1)
    first_col = col == 0               # column 0 of every image
    first_row = (row % img_h) == 0     # row 0 of every channel slab

    def tensor_gradient(x):
        # left neighbour (zero at col 0)  == F.pad(img, [1,0,0,0]) path
        left = jnp.where(first_col, 0.0, pltpu.roll(x, shift=1, axis=1))
        # upper neighbour (zero at row 0) == F.pad(img, [0,0,1,0]) path
        up = jnp.where(first_row, 0.0, pltpu.roll(x, shift=1, axis=0))
        gx = left - x
        gy = up - x
        if l1:
            return jnp.abs(gx) + jnp.abs(gy)
        return jnp.sqrt(gx * gx + gy * gy)

    diff = p - g
    sq_sum = jnp.sum(diff * diff)                                       # MSE numerator
    gd_sum = jnp.sum(jnp.abs(tensor_gradient(p) - tensor_gradient(g)))  # L1 numerator

    sq_ref[...] = jnp.broadcast_to(sq_sum, sq_ref.shape).astype(sq_ref.dtype)
    gd_ref[...] = jnp.broadcast_to(gd_sum, gd_ref.shape).astype(gd_ref.dtype)


def _anneal_scale(global_step, alpha, beta):
    return jnp.asarray(beta, jnp.float32) * jnp.power(
        jnp.asarray(alpha, jnp.float32), jnp.asarray(global_step, jnp.float32))


def loss_anneal(global_step, pred_i, ground_truth, *, alpha=0.9998, beta=100.0,
                gradient_L1=True):
    """LossAnneal.forward.

    global_step : python/int scalar
    pred_i      : (B, N, C, H, W)
    ground_truth: (B, C, H, W)
    returns     : scalar float32
    """
    B, N, C, H, W = pred_i.shape
    CH = C * H
    # Fold channels onto the sublane axis; pure layout plumbing on the wrapper side.
    pred2 = pred_i.reshape(B, N, CH, W)
    gt2 = ground_truth.reshape(B, CH, W)

    kernel = functools.partial(_loss_basic_partial_kernel, img_h=H, l1=gradient_L1)

    sq_part, gd_part = pl.pallas_call(
        kernel,
        out_shape=(jax.ShapeDtypeStruct((B, N, 8, 128), jnp.float32),
                   jax.ShapeDtypeStruct((B, N, 8, 128), jnp.float32)),
        grid_spec=pltpu.PrefetchScalarGridSpec(
            num_scalar_prefetch=0,
            grid=(B, N),
            in_specs=[
                pl.BlockSpec((1, 1, CH, W), lambda b, n: (b, n, 0, 0)),
                pl.BlockSpec((1, CH, W), lambda b, n: (b, 0, 0)),
            ],
            out_specs=[
                pl.BlockSpec((1, 1, 8, 128), lambda b, n: (b, n, 0, 0)),
                pl.BlockSpec((1, 1, 8, 128), lambda b, n: (b, n, 0, 0)),
            ],
        ),
        compiler_params=pltpu.CompilerParams(
            dimension_semantics=("parallel", "parallel"),
            vmem_limit_bytes=48 * 1024 * 1024),
    )(pred2, gt2)

    # Final scalar reduction + annealing factor: cheap, done in plain JAX.
    denom = jnp.float32(B * N * C * H * W)
    loss = (jnp.sum(sq_part[:, :, 0, 0]) + jnp.sum(gd_part[:, :, 0, 0])) / denom
    return _anneal_scale(global_step, alpha, beta) * loss


def _loss_anneal_ref(global_step, pred_i, gt, alpha=0.9998, beta=100.0, l1=True):
    """Pure-JAX mirror of the PyTorch forward (for verification)."""
    def grad(img):
        H, W = img.shape[-2], img.shape[-1]
        lead = [(0, 0)] * (img.ndim - 2)
        l = jnp.pad(img, lead + [(0, 0), (1, 0)])
        r = jnp.pad(img, lead + [(0, 0), (0, 1)])
        u = jnp.pad(img, lead + [(1, 0), (0, 0)])
        d = jnp.pad(img, lead + [(0, 1), (0, 0)])
        gx = (l - r)[..., :H, :W]
        gy = (u - d)[..., :H, :W]
        if l1:
            return jnp.abs(gx) + jnp.abs(gy)
        return jnp.sqrt(gx ** 2 + gy ** 2)

    n = pred_i.shape[1]
    loss = jnp.float32(0.0)
    for i in range(n):
        p = pred_i[:, i]
        loss = loss + jnp.mean((p - gt) ** 2) + jnp.mean(jnp.abs(grad(p) - grad(gt)))
    loss = loss / n
    return _anneal_scale(global_step, alpha, beta) * loss


if __name__ == "__main__":
    key = jax.random.PRNGKey(0)
    kp, kg = jax.random.split(key)
    B, N, C, H, W = 2, 4, 3, 16, 16
    pred_i = jax.random.normal(kp, (B, N, C, H, W), dtype=jnp.float32)
    gt = jax.random.normal(kg, (B, C, H, W), dtype=jnp.float32)
    global_step = 1000

    # Module default path (gradient_L1=True).
    out = jax.block_until_ready(loss_anneal(global_step, pred_i, gt))
    ref = jax.block_until_ready(_loss_anneal_ref(global_step, pred_i, gt, l1=True))
    assert out.shape == ref.shape
    assert jnp.allclose(out, ref, rtol=1e-4, atol=1e-5), (out, ref)

    # Exercise the L2 gradient branch of TensorGradient as well.
    out2 = jax.block_until_ready(
        loss_anneal(global_step, pred_i, gt, gradient_L1=False))
    ref2 = jax.block_until_ready(
        _loss_anneal_ref(global_step, pred_i, gt, l1=False))
    assert jnp.allclose(out2, ref2, rtol=1e-4, atol=1e-5), (out2, ref2)

    print("KERNEL_OK")
</pallas_src>

<mosaic_0001>
module attributes {stable_mosaic.version = 11 : i64} {
  func.func @_loss_basic_partial_kernel(%arg0: i32, %arg1: i32, %arg2: memref<1x1x48x16xf32, #tpu.memory_space<vmem>>, %arg3: memref<1x48x16xf32, #tpu.memory_space<vmem>>, %arg4: memref<1x1x8x128xf32, #tpu.memory_space<vmem>>, %arg5: memref<1x1x8x128xf32, #tpu.memory_space<vmem>>) attributes {dimension_semantics = [#tpu.dimension_semantics<parallel>, #tpu.dimension_semantics<parallel>], iteration_bounds = array<i64: 2, 4>, scalar_prefetch = 0 : i64, scratch_operands = 0 : i64, tpu.core_type = #tpu.core_type<tc>, window_params = [{transform_indices = @transform_0, window_bounds = array<i64: 1, 1, 48, 16>}, {transform_indices = @transform_1, window_bounds = array<i64: 1, 48, 16>}, {transform_indices = @transform_2, window_bounds = array<i64: 1, 1, 8, 128>}, {transform_indices = @transform_3, window_bounds = array<i64: 1, 1, 8, 128>}]} {
    %c0 = arith.constant 0 : index
    %c0_0 = arith.constant 0 : index
    %c0_1 = arith.constant 0 : index
    %c0_2 = arith.constant 0 : index
    %0 = vector.load %arg2[%c0, %c0_0, %c0_1, %c0_2] : memref<1x1x48x16xf32, #tpu.memory_space<vmem>>, vector<1x1x48x16xf32>
    %1 = vector.shape_cast %0 : vector<1x1x48x16xf32> to vector<48x16xf32>
    %c0_3 = arith.constant 0 : index
    %c0_4 = arith.constant 0 : index
    %c0_5 = arith.constant 0 : index
    %2 = vector.load %arg3[%c0_3, %c0_4, %c0_5] : memref<1x48x16xf32, #tpu.memory_space<vmem>>, vector<1x48x16xf32>
    %3 = vector.shape_cast %2 : vector<1x48x16xf32> to vector<48x16xf32>
    %4 = tpu.iota {dimensions = array<i32: 0>} : vector<48x16xi32>
    %5 = tpu.iota {dimensions = array<i32: 1>} : vector<48x16xi32>
    %c0_i32 = arith.constant 0 : i32
    %6 = vector.broadcast %c0_i32 : i32 to vector<48x16xi32>
    %7 = arith.cmpi eq, %5, %6 : vector<48x16xi32>
    %c16_i32 = arith.constant 16 : i32
    %c0_i32_6 = arith.constant 0 : i32
    %8 = arith.cmpi eq, %c16_i32, %c0_i32_6 : i32
    %c1_i32 = arith.constant 1 : i32
    %9 = arith.select %8, %c1_i32, %c16_i32 : i32
    %10 = vector.broadcast %9 : i32 to vector<48x16xi32>
    %11 = arith.remsi %4, %10 : vector<48x16xi32>
    %c0_i32_7 = arith.constant 0 : i32
    %12 = vector.broadcast %c0_i32_7 : i32 to vector<48x16xi32>
    %13 = arith.cmpi ne, %11, %12 : vector<48x16xi32>
    %c0_i32_8 = arith.constant 0 : i32
    %14 = vector.broadcast %c0_i32_8 : i32 to vector<48x16xi32>
    %15 = arith.cmpi slt, %11, %14 : vector<48x16xi32>
    %c0_i32_9 = arith.constant 0 : i32
    %16 = arith.cmpi slt, %9, %c0_i32_9 : i32
    %17 = vector.broadcast %16 : i1 to vector<48x16xi1>
    %18 = vector.broadcast %17 : vector<48x16xi1> to vector<48x16xi1>
    %19 = arith.xori %15, %18 : vector<48x16xi1>
    %20 = arith.andi %19, %13 : vector<48x16xi1>
    %21 = vector.broadcast %9 : i32 to vector<48x16xi32>
    %22 = arith.addi %11, %21 : vector<48x16xi32>
    %23 = arith.select %20, %22, %11 : vector<48x16xi1>, vector<48x16xi32>
    %c0_i32_10 = arith.constant 0 : i32
    %24 = vector.broadcast %c0_i32_10 : i32 to vector<48x16xi32>
    %25 = arith.cmpi eq, %23, %24 : vector<48x16xi32>
    %26 = arith.subf %1, %3 : vector<48x16xf32>
    %27 = arith.mulf %26, %26 : vector<48x16xf32>
    %28 = vector.shape_cast %27 : vector<48x16xf32> to vector<1x48x16xf32>
    %cst = arith.constant dense<0.000000e+00> : vector<1xf32>
    %29 = vector.multi_reduction <add>, %28, %cst [1, 2] : vector<1x48x16xf32> to vector<1xf32>
    %30 = vector.shape_cast %29 : vector<1xf32> to vector<1x1x1xf32>
    %31 = vector.extract %30[0, 0, 0] : f32 from vector<1x1x1xf32>
    %c1_i32_11 = arith.constant 1 : i32
    %32 = tpu.dynamic_rotate %1 by %c1_i32_11 dim 1 : vector<48x16xf32>, i32 -> vector<48x16xf32>
    %cst_12 = arith.constant 0.000000e+00 : f32
    %33 = vector.broadcast %cst_12 : f32 to vector<48x16xf32>
    %34 = arith.select %7, %33, %32 : vector<48x16xi1>, vector<48x16xf32>
    %c1_i32_13 = arith.constant 1 : i32
    %35 = tpu.dynamic_rotate %1 by %c1_i32_13 dim 0 : vector<48x16xf32>, i32 -> vector<48x16xf32>
    %cst_14 = arith.constant 0.000000e+00 : f32
    %36 = vector.broadcast %cst_14 : f32 to vector<48x16xf32>
    %37 = arith.select %25, %36, %35 : vector<48x16xi1>, vector<48x16xf32>
    %38 = arith.subf %34, %1 : vector<48x16xf32>
    %39 = arith.subf %37, %1 : vector<48x16xf32>
    %40 = math.absf %38 : vector<48x16xf32>
    %41 = math.absf %39 : vector<48x16xf32>
    %42 = arith.addf %40, %41 : vector<48x16xf32>
    %c1_i32_15 = arith.constant 1 : i32
    %43 = tpu.dynamic_rotate %3 by %c1_i32_15 dim 1 : vector<48x16xf32>, i32 -> vector<48x16xf32>
    %cst_16 = arith.constant 0.000000e+00 : f32
    %44 = vector.broadcast %cst_16 : f32 to vector<48x16xf32>
    %45 = arith.select %7, %44, %43 : vector<48x16xi1>, vector<48x16xf32>
    %c1_i32_17 = arith.constant 1 : i32
    %46 = tpu.dynamic_rotate %3 by %c1_i32_17 dim 0 : vector<48x16xf32>, i32 -> vector<48x16xf32>
    %cst_18 = arith.constant 0.000000e+00 : f32
    %47 = vector.broadcast %cst_18 : f32 to vector<48x16xf32>
    %48 = arith.select %25, %47, %46 : vector<48x16xi1>, vector<48x16xf32>
    %49 = arith.subf %45, %3 : vector<48x16xf32>
    %50 = arith.subf %48, %3 : vector<48x16xf32>
    %51 = math.absf %49 : vector<48x16xf32>
    %52 = math.absf %50 : vector<48x16xf32>
    %53 = arith.addf %51, %52 : vector<48x16xf32>
    %54 = arith.subf %42, %53 : vector<48x16xf32>
    %55 = math.absf %54 : vector<48x16xf32>
    %56 = vector.shape_cast %55 : vector<48x16xf32> to vector<1x48x16xf32>
    %cst_19 = arith.constant dense<0.000000e+00> : vector<1xf32>
    %57 = vector.multi_reduction <add>, %56, %cst_19 [1, 2] : vector<1x48x16xf32> to vector<1xf32>
    %58 = vector.shape_cast %57 : vector<1xf32> to vector<1x1x1xf32>
    %59 = vector.extract %58[0, 0, 0] : f32 from vector<1x1x1xf32>
    %60 = vector.broadcast %31 : f32 to vector<1x1x8x128xf32>
    %c0_20 = arith.constant 0 : index
    %c0_21 = arith.constant 0 : index
    %c0_22 = arith.constant 0 : index
    %c0_23 = arith.constant 0 : index
    %61 = vector.load %arg4[%c0_20, %c0_21, %c0_22, %c0_23] : memref<1x1x8x128xf32, #tpu.memory_space<vmem>>, vector<1x1x8x128xf32>
    tpu.vector_store %arg4[%c0_20, %c0_21, %c0_22, %c0_23], %60 {strides = array<i32>} : memref<1x1x8x128xf32, #tpu.memory_space<vmem>>, vector<1x1x8x128xf32>,
    %62 = vector.broadcast %59 : f32 to vector<1x1x8x128xf32>
    %c0_24 = arith.constant 0 : index
    %c0_25 = arith.constant 0 : index
    %c0_26 = arith.constant 0 : index
    %c0_27 = arith.constant 0 : index
    %63 = vector.load %arg5[%c0_24, %c0_25, %c0_26, %c0_27] : memref<1x1x8x128xf32, #tpu.memory_space<vmem>>, vector<1x1x8x128xf32>
    tpu.vector_store %arg5[%c0_24, %c0_25, %c0_26, %c0_27], %62 {strides = array<i32>} : memref<1x1x8x128xf32, #tpu.memory_space<vmem>>, vector<1x1x8x128xf32>,
    return
  }
  func.func @transform_0(%arg0: i32, %arg1: i32) -> (i32, i32, i32, i32) {
    %c0_i32 = arith.constant 0 : i32
    %c0_i32_0 = arith.constant 0 : i32
    %c0_i32_1 = arith.constant 0 : i32
    return %arg0, %arg1, %c0_i32, %c0_i32_0 : i32, i32, i32, i32
  }
  func.func @transform_1(%arg0: i32, %arg1: i32) -> (i32, i32, i32) {
    %c0_i32 = arith.constant 0 : i32
    %c0_i32_0 = arith.constant 0 : i32
    %c0_i32_1 = arith.constant 0 : i32
    return %arg0, %c0_i32, %c0_i32_0 : i32, i32, i32
  }
  func.func @transform_2(%arg0: i32, %arg1: i32) -> (i32, i32, i32, i32) {
    %c0_i32 = arith.constant 0 : i32
    %c0_i32_0 = arith.constant 0 : i32
    %c0_i32_1 = arith.constant 0 : i32
    return %arg0, %arg1, %c0_i32, %c0_i32_0 : i32, i32, i32, i32
  }
  func.func @transform_3(%arg0: i32, %arg1: i32) -> (i32, i32, i32, i32) {
    %c0_i32 = arith.constant 0 : i32
    %c0_i32_0 = arith.constant 0 : i32
    %c0_i32_1 = arith.constant 0 : i32
    return %arg0, %arg1, %c0_i32, %c0_i32_0 : i32, i32, i32, i32
  }
}

</mosaic_0001>

<bundles_post_ra>
// kernel: tpu_custom_call.1
= control target key start
LH: loop header
LB: loop body
LE: loop exit
PB: predicated region body
PF: predicated region fallthrough
CT: control target
= control target key end

     0   :  { %s1470_s0 = inlined_call_operand.vmem [shape: f32[2,4,48,16], index: 0, kind: input, shape index: {}]   ;;  %s1471_s1 = inlined_call_operand.vmem [shape: f32[2,48,16], index: 1, kind: input, shape index: {}]   ;;  %s1472_s2 = inlined_call_operand.hbm [shape: f32[2,4,8,128], index: 2, kind: output, shape index: {0}]   ;;  %s1473_s3 = inlined_call_operand.hbm [shape: f32[2,4,8,128], index: 3, kind: output, shape index: {1}]  }
   0x1   :  { %1474 = sst [smem:[#allocation8_spill]] %s1470_s0 }
   0x2   :  { %1475 = sst [smem:[#allocation9_spill]] %s1471_s1 }
   0x3   :  { %9 = vsyncpa [#allocation3], 0 }
   0x4   :  { %11 = vsyncpa [#allocation3 + $0x1], 0 }
   0x5   :  { %12 = vsyncpa [#allocation5], 0 }
   0x6   :  { %14 = vsyncpa [#allocation5 + $0x1], 0  ;;  %s1048_s12 = smov 0   ;;  %s1050_s13 = smov 0  }
   0x7   :  { %s1052_s14 = smov 0   ;;  %s1054_s15 = smov 0  }
   0x8   :  { %s1056_s16 = smov 0   ;;  %s1058_s17 = smov 0  }
   0x9   :  { %s1060_s18 = smov 0   ;;  %s1062_s19 = smov 0  }
   0xa LB: > { %s796_s20 = sadd.s32 4294967295, %s1024_s19   ;;  %s797_s21 = sadd.s32 4294967294, %s1024_s19   ;;  %s1024_s19 = sphi %s1062_s19, %s20_s19   ;;  %s1020_s18 = sphi %s1060_s18, %s1492_s18   ;;  %s1016_s17 = sphi %s1058_s17, %s1491_s17   ;;  %s1012_s16 = sphi %s1056_s16, %s1490_s16   ;;  %s1008_s15 = sphi %s1054_s15, %s1489_s15   ;;  %s1004_s14 = sphi %s1052_s14, %s1488_s14   ;;  %s1000_s13 = sphi %s1050_s13, %s1487_s13   ;;  %s996_s12 = sphi %s1048_s12, %s1486_s12  }
   0xb   : > { %s29_s22 = sadd.s32 1, %s1016_s17  ;;  %s32_s23 = sadd.s32 1, %s1020_s18 }
   0xc   : > { %p30_p0 = scmp.ge.s32.totalorder %s29_s22, 4  ;;  %p105_p1 = scmp.ne.s32.totalorder %s1004_s14, %s1000_s13 }
   0xd   : > { %p106_p2 = scmp.eq.s32.totalorder %s796_s20, 7  ;;  %p111_p5 = scmp.ne.s32.totalorder %s1000_s13, %s996_s12 }
   0xe   : > { %s1494_s22 = smov (%p30_p0, %s29_s22), 0  ;;  %s1496_s23 = smov (!%p30_p0, %s32_s23), %s1020_s18 }
   0xf   : > { %s91_s24 = ssub.s32 %s1016_s17, %s1494_s22  ;;  %p1099_p3 = por %p106_p2, %p105_p1 }
  0x10   : > { %p34_p4 = scmp.ge.s32.totalorder %s1496_s23, 2  ;;  %p112_p6 = scmp.eq.s32.totalorder %s797_s21, 7 }
  0x11   : > { %p800_p7 = scmp.ge.s32.totalorder %s1024_s19, 1  ;;  %p178_p9 = scmp.lt.s32.totalorder %s1024_s19, 9 }
  0x12   : > { %s1498_s23 = smov (%p34_p4, %s1496_s23), 0  ;;  %p1108_p8 = por %p112_p6, %p111_p5 }
  0x13   : > { %s90_s27 = ssub.s32 %s1020_s18, %s1498_s23  ;;  %s95_s28 = sadd.s32 1, %s1004_s14 }
  0x14   : > { %s92_s29 = sor.u32 %s91_s24, %s90_s27  ;;  %p179_p10 = pnand %p800_p7, %p178_p9 }
  0x15   : > { %p93_p11 = scmp.eq.s32.totalorder %s92_s29, 0  ;;  %p216_p12 = scmp.lt.s32.totalorder (!%p179_p10), %s1012_s16, 1 }
  0x16   : > { %182 = sbr.rel (%p179_p10) target bundleno = 616 (0x268), region = 28  ;;  %p218_p13 = scmp.lt.s32.totalorder (!%p179_p10), %s1008_s15, 3 }
  0x17   : > { %s1117_s30 = scalar_select %p93_p11, %s1004_s14, %s95_s28  }
  0x18   : > { %s1478_s1 = sld [smem:[#allocation9_spill]] (!%p179_p10)  ;;  %s1026_s20 = smov (!%p179_p10), 16  }
  0x19   : > { %s1479_s0 = sld [smem:[#allocation8_spill]] (!%p179_p10) }
  0x1b   : > { %s217_s4 = scalar_select %p216_p12, %s1012_s16, 1  ;;  %vm363_vm0 = vcmask 1047680   ;;  %v242_v60 = vlaneseq  ;;  %vm342_vm3 = vcmask 130048  }
  0x1c   : > { %s219_s5 = scalar_select %p218_p13, %s1008_s15, 3 }
  0x1d   : > { %s815_s6 = smul.u32 48, %s217_s4  ;;  %v1249_v61 = vshrl.u32 %v242_v60, 7 }
  0x1e   : > { %s813_s7 = smul.u32 6, %s219_s5  ;;  %s807_s5 = sshll.u32 %s1012_s16, 2 }
  0x1f   : > { %s229_s10 = scalar_lea.vmem %s1478_s1, %s815_s6  ;;  %s814_s11 = smul.u32 24, %s217_s4  ;;  %v256_v62 = vand.u32 15, %v1249_v61  ;;  %vm436_vm1 = vcmp.lt.s32.totalorder %v1249_v61, 1 }
  0x20   : > { %v1126_v0 = vld [vmem:[%s229_s10] sm:$0xff]  ;;  %v1130_v1 = vld [vmem:[%s229_s10 + $0x10] sm:$0xff]  ;;  %v1141_v3 = vld [vmem:[%s229_s10 + $0x8] sm:$0xff]  ;;  %s1027_s4 = smov 113   ;;  %s645_s6 = sadd.s32 %s1008_s15, %s807_s5 }
  0x21   : > { %479 = vrot.lane.b32.xlu1 %v1126_v0, %s1026_s20  ;;  %s222_s21 = sadd.s32 %s814_s11, %s813_s7  ;;  %485 = vrot.lane.b32.xlu2 %v1130_v1, %s1026_s20  ;;  %v1153_v6 = vld [vmem:[%s229_s10 + $0x18] sm:$0xff]  ;;  %v1167_v10 = vld [vmem:[%s229_s10 + $0x28] sm:$0xff]  ;;  %v545_v63 = vrot.slane %v1126_v0, 7  ;;  %vm1260_vm2 = vcmp.eq.s32.totalorder %v256_v62, 0  ;;  %s1411_s7 = sand.u32 1, %s1000_s13  }
  0x22   : > { %s803_s24 = sshll.u32 %s222_s21, 3  ;;  %v1171_v11 = vld [vmem:[%s229_s10 + $0x20] sm:$0xff]  ;;  %s808_s8 = sshll.u32 %s645_s6, 3 }
  0x23   : > { %s224_s29 = scalar_lea.vmem %s1479_s0, %s803_s24  ;;  %s801_s9 = sshll.u32 %s1411_s7, 3 }
  0x24   : > { %v1137_v2 = vld [vmem:[%s224_s29] sm:$0xff]  ;;  %v1143_v4 = vld [vmem:[%s224_s29 + $0x10] sm:$0xff]  ;;  %v1147_v5 = vld [vmem:[%s224_s29 + $0x8] sm:$0xff]  ;;  %s208_s21 = scalar_lea.vmem [#allocation2], %s801_s9  ;;  %s630_s15 = scalar_lea.sflag [#allocation3], %s1411_s7 }
  0x25   : > { %364 = vrot.lane.b32.xlu0 %v1137_v2, %s1026_s20  ;;  %v1155_v7 = vld [vmem:[%s224_s29 + $0x20] sm:$0xff]  ;;  %v1159_v8 = vld [vmem:[%s224_s29 + $0x18] sm:$0xff]  ;;  %v1165_v9 = vld [vmem:[%s224_s29 + $0x28] sm:$0xff]  ;;  %s649_s24 = sshll.u32 %s208_s21, 4  ;;  %s918_s6 = scalar_lea.hbm %s1472_s2, 64  ;;  %s650_s24 = int_to_ptr.vmem [resolvable:$true] %s649_s24 }
  0x26   : > { %v433_v62 = vrot.slane %v1159_v8, 7 }
  0x29   : > { %482 = vrot.lane.b32.xlu1 %v1141_v3, %s1026_s20  ;;  %370 = vrot.lane.b32.xlu2 %v1143_v4, %s1026_s20 }
  0x2d   : > { %367 = vrot.lane.b32.xlu0 %v1147_v5, %s1026_s20 }
  0x31   : > { %488 = vrot.lane.b32.xlu1 %v1153_v6, %s1026_s20  ;;  %376 = vrot.lane.b32.xlu2 %v1155_v7, %s1026_s20 }
  0x35   : > { %373 = vrot.lane.b32.xlu0 %v1159_v8, %s1026_s20 }
  0x39   : > { %379 = vrot.lane.b32.xlu1 %v1165_v9, %s1026_s20  ;;  %494 = vrot.lane.b32.xlu2 %v1167_v10, %s1026_s20 }
  0x3d   : > { %491 = vrot.lane.b32.xlu0 %v1171_v11, %s1026_s20 }
  0x7b   : > { %v486_v12 = vpop.permute.xlu2 %485 }
  0x7c   : > { %v487_v17 = vsel %vm363_vm0, %v486_v12, %v1130_v1  ;;  %v550_v12 = vrot.slane %v1167_v10, 7 }
  0x83   : > { %v371_v15 = vpop.permute.xlu2 %370 }
  0x84   : > { %v372_v32 = vsel %vm363_vm0, %v371_v15, %v1143_v4  ;;  %v330_v15 = vsub.f32 %v1137_v2, %v1126_v0 }
  0x8b   : > { %v377_v20 = vpop.permute.xlu2 %376 }
  0x8c   : > { %v378_v23 = vsel %vm363_vm0, %v377_v20, %v1155_v7  ;;  %v546_v20 = vrot.slane %v1141_v3, 7 }
  0x93   : > { %v480_v13 = vpop.permute.xlu1 %479  ;;  %v495_v27 = vpop.permute.xlu2 %494 }
  0x94   : > { %v481_v14 = vsel %vm363_vm0, %v480_v13, %v1126_v0  ;;  %v496_v29 = vsel %vm363_vm0, %v495_v27, %v1167_v10  ;;  %v245_v13 = vadd.s32 16, %v1249_v61  ;;  %v435_v27 = vrot.slane %v1165_v9, 7 }
  0x95   : > { %497 = vrot.lane.b32.xlu2 %v481_v14, %s1026_s20 }
  0x97   : > { %v365_v16 = vpop.permute.xlu0 %364 }
  0x98   : > { %v366_v25 = vsel %vm363_vm0, %v365_v16, %v1137_v2  ;;  %v331_v16 = vsub.f32 %v1147_v5, %v1141_v3 }
  0x9b   : > { %v483_v18 = vpop.permute.xlu1 %482 }
  0x9c   : > { %v484_v19 = vsel %vm363_vm0, %v483_v18, %v1141_v3  ;;  %v556_v18 = vsel %vm436_vm1, %v550_v12, %v545_v63 }
  0x9d   : > { %499 = vrot.lane.b32.xlu0 %v484_v19, %s1026_s20  ;;  %501 = vrot.lane.b32.xlu2 %v487_v17, %s1026_s20  ;;  %v332_v19 = vsub.f32 %v1143_v4, %v1130_v1 }
  0x9f   : > { %v368_v21 = vpop.permute.xlu0 %367 }
  0xa0   : > { %v369_v30 = vsel %vm363_vm0, %v368_v21, %v1147_v5  ;;  %v547_v21 = vrot.slane %v1130_v1, 7 }
  0xa3   : > { %v489_v22 = vpop.permute.xlu1 %488 }
  0xa4   : > { %v490_v24 = vsel %vm363_vm0, %v489_v22, %v1153_v6  ;;  %v336_v22 = vmul.f32 %v330_v15, %v330_v15 }
  0xa5   : > { %503 = vrot.lane.b32.xlu1 %v490_v24, %s1026_s20  ;;  %382 = vrot.lane.b32.xlu0 %v366_v25, %s1026_s20  ;;  %v270_v24 = vand.u32 15, %v245_v13  ;;  %v333_v25 = vsub.f32 %v1159_v8, %v1153_v6 }
  0xa6   : > { %390 = vrot.lane.b32.xlu2 %v378_v23, %s1026_s20  ;;  %v337_v23 = vmul.f32 %v331_v16, %v331_v16 }
  0xa7   : > { %v374_v26 = vpop.permute.xlu0 %373  ;;  %vm1288_vm4 = vcmp.eq.s32.totalorder %v270_v24, 0 }
  0xa8   : > { %v375_v28 = vsel %vm363_vm0, %v374_v26, %v1159_v8  ;;  %v338_v26 = vmul.f32 %v332_v19, %v332_v19 }
  0xab   : > { %v380_v34 = vpop.permute.xlu1 %379 }
  0xac   : > { %v381_v35 = vsel %vm363_vm0, %v380_v34, %v1165_v9 }
  0xad   : > { %384 = vrot.lane.b32.xlu1 %v369_v30, %s1026_s20  ;;  %388 = vrot.lane.b32.xlu0 %v375_v28, %s1026_s20  ;;  %v430_v28 = vrot.slane %v1137_v2, 7  ;;  %v344_v30 = vsel %vm342_vm3, %v337_v23, 0.0 }
  0xae   : > { %507 = vrot.lane.b32.xlu2 %v496_v29, %s1026_s20  ;;  %v343_v29 = vsel %vm342_vm3, %v336_v22, 0.0 }
  0xaf   : > { %v492_v31 = vpop.permute.xlu0 %491  ;;  %v345_v34 = vadd.f32 %v344_v30, %v343_v29 }
  0xb0   : > { %v493_v33 = vsel %vm363_vm0, %v492_v31, %v1171_v11 }
  0xb5   : > { %386 = vrot.lane.b32.xlu1 %v372_v32, %s1026_s20  ;;  %505 = vrot.lane.b32.xlu0 %v493_v33, %s1026_s20  ;;  %v334_v32 = vsub.f32 %v1155_v7, %v1171_v11  ;;  %v339_v33 = vmul.f32 %v333_v25, %v333_v25 }
  0xbd   : > { %392 = vrot.lane.b32.xlu1 %v381_v35, %s1026_s20  ;;  %v346_v35 = vsel %vm342_vm3, %v338_v26, 0.0  ;;  %v549_v26 = vrot.slane %v1171_v11, 7  ;;  %s647_s20 = scalar_lea.hbm %s1472_s2, %s808_s8 }
  0xbe   : > { %s651_s27 = sshll.u32 %s647_s20, 4  ;;  %s652_s27 = int_to_ptr.hbm [resolvable:$true] %s651_s27 }
  0xbf   : > { %s912_s16 = sshra.s32 %s652_s27, 4  ;;  %s913_s16 = int_to_ptr.hbm [resolvable:$true] %s912_s16 }
  0xc0   : > { %s914_s29 = scalar_lea.hbm %s913_s16, 8  ;;  %p919_p4 = scmp.lt.s32.totalorder %s913_s16, %s1472_s2 }
  0xc1   : > { %p915_p0 = scmp.ne.s32.totalorder %s913_s16, %s914_s29  ;;  %p920_p5 = scmp.lt.s32.totalorder %s918_s6, %s914_s29 }
  0xc3   : > { %p916_p1 = pnand %p915_p0, %p1099_p3  ;;  %p921_p6 = por %p920_p5, %p919_p4 }
  0xc5   : > { %p917_p2 = pneg %p916_p1 }
  0xc7   : > { %p922_p7 = pnand %p921_p6, %p917_p2 }
  0xef   : > { %v498_v36 = vpop.permute.xlu2 %497 }
  0xf0   : > { %v509_v37 = vsel %vm363_vm0, %v498_v36, %v1126_v0  ;;  %v1281_v36 = vand.u32 127, %v242_v60  ;;  %v432_v60 = vrot.slane %v1143_v4, 7 }
  0xf1   : > { %521 = vrot.lane.b32.xlu2 %v509_v37, %s1027_s4  ;;  %v557_v37 = vsel %vm1260_vm2, 0.0, %v556_v18 }
  0xf2   : > { %vm251_vm5 = vcmp.eq.s32.totalorder %v1281_v36, 0  ;;  %v439_v30 = vsel %vm436_vm1, %v432_v60, %v433_v62 }
  0xf7   : > { %v502_v38 = vpop.permute.xlu2 %501 }
  0xf8   : > { %v511_v39 = vsel %vm363_vm0, %v502_v38, %v1130_v1 }
  0xf9   : > { %525 = vrot.lane.b32.xlu2 %v511_v39, %s1027_s4  ;;  %v335_v39 = vsub.f32 %v1165_v9, %v1167_v10 }
 0x100   : > { %v391_v42 = vpop.permute.xlu2 %390 }
 0x101   : > { %v398_v43 = vsel %vm363_vm0, %v391_v42, %v1155_v7  ;;  %v348_v42 = vsel %vm342_vm3, %v339_v33, 0.0 }
 0x102   : > { %414 = vrot.lane.b32.xlu2 %v398_v43, %s1027_s4 }
 0x108   : > { %v508_v48 = vpop.permute.xlu2 %507 }
 0x109   : > { %v514_v49 = vsel %vm363_vm0, %v508_v48, %v1167_v10  ;;  %v341_v48 = vmul.f32 %v335_v39, %v335_v39 }
 0x10a   : > { %531 = vrot.lane.b32.xlu2 %v514_v49, %s1027_s4 }
 0x10f   : > { %v500_v40 = vpop.permute.xlu0 %499 }
 0x110   : > { %v510_v41 = vsel %vm363_vm0, %v500_v40, %v1141_v3  ;;  %v340_v40 = vmul.f32 %v334_v32, %v334_v32 }
 0x111   : > { %523 = vrot.lane.b32.xlu0 %v510_v41, %s1027_s4  ;;  %v347_v41 = vadd.f32 %v346_v35, %v345_v34 }
 0x113   : > { %v349_v49 = vadd.f32 %v348_v42, %v347_v41 }
 0x117   : > { %v504_v44 = vpop.permute.xlu1 %503  ;;  %v383_v45 = vpop.permute.xlu0 %382 }
 0x118   : > { %v512_v46 = vsel %vm363_vm0, %v504_v44, %v1153_v6  ;;  %v394_v47 = vsel %vm363_vm0, %v383_v45, %v1137_v2  ;;  %v554_v44 = vsel %vm436_vm1, %v546_v20, %v547_v21  ;;  %v442_v45 = vsel %vm436_vm1, %v435_v27, %v430_v28 }
 0x119   : > { %527 = vrot.lane.b32.xlu1 %v512_v46, %s1027_s4  ;;  %406 = vrot.lane.b32.xlu0 %v394_v47, %s1027_s4  ;;  %v431_v46 = vrot.slane %v1147_v5, 7  ;;  %v247_v47 = vadd.s32 32, %v1249_v61 }
 0x11b   : > { %v441_v13 = vsel %vm436_vm1, %v430_v28, %v431_v46  ;;  %v284_v15 = vand.u32 15, %v247_v47  ;;  %v440_v34 = vsel %vm436_vm1, %v431_v46, %v432_v60 }
 0x11c   : > { %v456_v29 = vsub.f32 %v441_v13, %v1147_v5 }
 0x11d   : > { %vm1339_vm6 = vcmp.eq.s32.totalorder %v284_v15, 0 }
 0x11f   : > { %v385_v50 = vpop.permute.xlu1 %384  ;;  %v389_v51 = vpop.permute.xlu0 %388 }
 0x120   : > { %v395_v52 = vsel %vm363_vm0, %v385_v50, %v1147_v5  ;;  %v397_v53 = vsel %vm363_vm0, %v389_v51, %v1159_v8  ;;  %v350_v50 = vsel %vm342_vm3, %v340_v40, 0.0  ;;  %v1303_v51 = vsub.f32 %v557_v37, %v1126_v0 }
 0x121   : > { %408 = vrot.lane.b32.xlu1 %v395_v52, %s1027_s4  ;;  %412 = vrot.lane.b32.xlu0 %v397_v53, %s1027_s4  ;;  %v559_v52 = vsel %vm1288_vm4, 0.0, %v554_v44  ;;  %v555_v53 = vsel %vm436_vm1, %v545_v63, %v546_v20  ;;  %v434_v63 = vrot.slane %v1155_v7, 7  ;;  %v458_v40 = vsub.f32 %v439_v30, %v1159_v8 }
 0x122   : > { %v581_v18 = vand.u32 2147483647, %v1303_v51  ;;  %v570_v20 = vsub.f32 %v555_v53, %v1141_v3  ;;  %v1331_v28 = vsub.f32 %v559_v52, %v1130_v1  ;;  %v468_v44 = vand.u32 2147483647, %v456_v29 }
 0x123   : > { %v438_v33 = vsel %vm436_vm1, %v433_v62, %v434_v63 }
 0x124   : > { %v582_v37 = vand.u32 2147483647, %v570_v20  ;;  %v447_v46 = vsel %vm1339_vm6, 0.0, %v438_v33 }
 0x127   : > { %v387_v54 = vpop.permute.xlu1 %386  ;;  %v506_v55 = vpop.permute.xlu0 %505 }
 0x128   : > { %v396_v56 = vsel %vm363_vm0, %v387_v54, %v1143_v4  ;;  %v513_v57 = vsel %vm363_vm0, %v506_v55, %v1171_v11  ;;  %v351_v54 = vadd.f32 %v350_v50, %v349_v49  ;;  %v352_v55 = vsel %vm342_vm3, %v341_v48, 0.0 }
 0x129   : > { %410 = vrot.lane.b32.xlu1 %v396_v56, %s1027_s4  ;;  %529 = vrot.lane.b32.xlu0 %v513_v57, %s1027_s4  ;;  %v548_v56 = vrot.slane %v1153_v6, 7 }
 0x12a   : > { %v353_v16 = vadd.f32 %v352_v55, %v351_v54  ;;  %v459_v54 = vsub.f32 %v447_v46, %v1155_v7 }
 0x12b   : > { %v552_v41 = vsel %vm436_vm1, %v548_v56, %v549_v26 }
 0x12c   : > { %v561_v53 = vsel %vm1339_vm6, 0.0, %v552_v41 }
 0x12f   : > { %v393_v58 = vpop.permute.xlu1 %392 }
 0x130   : > { %v399_v59 = vsel %vm363_vm0, %v393_v58, %v1165_v9 }
 0x131   : > { %416 = vrot.lane.b32.xlu1 %v399_v59, %s1027_s4  ;;  %v443_v59 = vsel %vm1260_vm2, 0.0, %v442_v45 }
 0x132   : > { %v455_v24 = vsub.f32 %v443_v59, %v1137_v2 }
 0x134   : > { %v467_v39 = vand.u32 2147483647, %v455_v24 }
 0x14b   : > { %v522_v14 = vpop.permute.xlu2 %521 }
 0x14c   : > { %v539_v19 = vsel %vm251_vm5, 0.0, %v522_v14  ;;  %v553_v14 = vsel %vm436_vm1, %v547_v21, %v548_v56 }
 0x14d   : > { %v563_v21 = vsub.f32 %v539_v19, %v1126_v0  ;;  %v470_v19 = vand.u32 2147483647, %v458_v40 }
 0x14f   : > { %v575_v43 = vand.u32 2147483647, %v563_v21 }
 0x153   : > { %v526_v38 = vpop.permute.xlu2 %525  ;;  %354 = vadd.xlane.f32.xlu0 %v353_v16 }
 0x154   : > { %v541_v22 = vsel %vm251_vm5, 0.0, %v526_v38 }
 0x155   : > { %v565_v35 = vsub.f32 %v541_v22, %v1130_v1  ;;  %v445_v1 = vsel %vm1288_vm4, 0.0, %v440_v34  ;;  %v471_v22 = vand.u32 2147483647, %v459_v54 }
 0x156   : > { %v457_v56 = vsub.f32 %v445_v1, %v1143_v4 }
 0x157   : > { %v577_v60 = vand.u32 2147483647, %v565_v35 }
 0x158   : > { %v469_v24 = vand.u32 2147483647, %v457_v56 }
 0x15c   : > { %v415_v25 = vpop.permute.xlu2 %414 }
 0x15d   : > { %v428_v0 = vsel %vm251_vm5, 0.0, %v415_v25 }
 0x15e   : > { %v453_v55 = vsub.f32 %v428_v0, %v1155_v7 }
 0x164   : > { %v532_v13 = vpop.permute.xlu2 %531 }
 0x165   : > { %v544_v30 = vsel %vm251_vm5, 0.0, %v532_v13 }
 0x183   : > { %v524_v31 = vpop.permute.xlu0 %523 }
 0x184   : > { %v540_v23 = vsel %vm251_vm5, 0.0, %v524_v31 }
 0x185   : > { %v564_v38 = vsub.f32 %v540_v23, %v1141_v3  ;;  %v465_v23 = vand.u32 2147483647, %v453_v55 }
 0x187   : > { %v576_v50 = vand.u32 2147483647, %v564_v38 }
 0x189   : > { %v588_v15 = vadd.f32 %v582_v37, %v576_v50  ;;  %v568_v37 = vsub.f32 %v544_v30, %v1167_v10 }
 0x18b   : > { %v528_v57 = vpop.permute.xlu1 %527  ;;  %v407_v58 = vpop.permute.xlu0 %406 }
 0x18c   : > { %v424_v17 = vsel %vm251_vm5, 0.0, %v407_v58  ;;  %v542_v3 = vsel %vm251_vm5, 0.0, %v528_v57  ;;  %v583_v57 = vand.u32 2147483647, %v1331_v28 }
 0x18d   : > { %v449_v32 = vsub.f32 %v424_v17, %v1137_v2  ;;  %v572_v2 = vsub.f32 %v553_v14, %v1153_v6  ;;  %v566_v58 = vsub.f32 %v542_v3, %v1153_v6  ;;  %v587_v17 = vadd.f32 %v581_v18, %v575_v43 }
 0x18e   : > { %v551_v6 = vsel %vm436_vm1, %v549_v26, %v550_v12  ;;  %v437_v12 = vsel %vm436_vm1, %v434_v63, %v435_v27  ;;  %v589_v41 = vadd.f32 %v583_v57, %v577_v60  ;;  %v580_v63 = vand.u32 2147483647, %v568_v37 }
 0x18f   : > { %v461_v47 = vand.u32 2147483647, %v449_v32  ;;  %v584_v62 = vand.u32 2147483647, %v572_v2  ;;  %v578_v25 = vand.u32 2147483647, %v566_v58  ;;  %v574_v26 = vsub.f32 %v551_v6, %v1167_v10 }
 0x191   : > { %v590_v38 = vadd.f32 %v584_v62, %v578_v25  ;;  %v586_v27 = vand.u32 2147483647, %v574_v26 }
 0x193   : > { %v409_v42 = vpop.permute.xlu1 %408  ;;  %v413_v45 = vpop.permute.xlu0 %412 }
 0x194   : > { %v425_v48 = vsel %vm251_vm5, 0.0, %v409_v42  ;;  %v427_v49 = vsel %vm251_vm5, 0.0, %v413_v45 }
 0x195   : > { %v450_v51 = vsub.f32 %v425_v48, %v1147_v5  ;;  %v452_v52 = vsub.f32 %v427_v49, %v1159_v8  ;;  %v473_v5 = vadd.f32 %v467_v39, %v461_v47  ;;  %v573_v8 = vsub.f32 %v561_v53, %v1171_v11 }
 0x197   : > { %v462_v59 = vand.u32 2147483647, %v450_v51  ;;  %v464_v20 = vand.u32 2147483647, %v452_v52  ;;  %v593_v32 = vsub.f32 %v473_v5, %v587_v17  ;;  %v585_v18 = vand.u32 2147483647, %v573_v8 }
 0x198   : > { %v592_v52 = vadd.f32 %v586_v27, %v580_v63 }
 0x199   : > { %v474_v16 = vadd.f32 %v468_v44, %v462_v59  ;;  %v476_v34 = vadd.f32 %v470_v19, %v464_v20  ;;  %v599_v42 = vand.u32 2147483647, %v593_v32  ;;  %v477_v44 = vadd.f32 %v471_v22, %v465_v23 }
 0x19b   : > { %v594_v14 = vsub.f32 %v474_v16, %v588_v15  ;;  %v411_v28 = vpop.permute.xlu1 %410  ;;  %v530_v29 = vpop.permute.xlu0 %529  ;;  %v605_v10 = vsel %vm342_vm3, %v599_v42, 0.0 }
 0x19c   : > { %v426_v31 = vsel %vm251_vm5, 0.0, %v411_v28  ;;  %v543_v33 = vsel %vm251_vm5, 0.0, %v530_v29 }
 0x19d   : > { %v451_v21 = vsub.f32 %v426_v31, %v1143_v4  ;;  %v567_v35 = vsub.f32 %v543_v33, %v1171_v11  ;;  %v600_v2 = vand.u32 2147483647, %v594_v14  ;;  %v460_v4 = vsub.f32 %v437_v12, %v1165_v9 }
 0x19e   : > { %v596_v11 = vsub.f32 %v476_v34, %v590_v38 }
 0x19f   : > { %v463_v39 = vand.u32 2147483647, %v451_v21  ;;  %v579_v40 = vand.u32 2147483647, %v567_v35  ;;  %v606_v7 = vsel %vm342_vm3, %v600_v2, 0.0 }
 0x1a0   : > { %v472_v1 = vand.u32 2147483647, %v460_v4  ;;  %v602_v47 = vand.u32 2147483647, %v596_v11  ;;  %v607_v51 = vadd.f32 %v606_v7, %v605_v10 }
 0x1a1   : > { %v475_v45 = vadd.f32 %v469_v24, %v463_v39  ;;  %v591_v46 = vadd.f32 %v585_v18, %v579_v40 }
 0x1a2   : > { %v610_v57 = vsel %vm342_vm3, %v602_v47, 0.0 }
 0x1a3   : > { %v595_v61 = vsub.f32 %v475_v45, %v589_v41  ;;  %v417_v0 = vpop.permute.xlu1 %416  ;;  %v597_v49 = vsub.f32 %v477_v44, %v591_v46 }
 0x1a4   : > { %v429_v3 = vsel %vm251_vm5, 0.0, %v417_v0 }
 0x1a5   : > { %v601_v48 = vand.u32 2147483647, %v595_v61  ;;  %v454_v50 = vsub.f32 %v429_v3, %v1165_v9  ;;  %v603_v56 = vand.u32 2147483647, %v597_v49 }
 0x1a7   : > { %v466_v53 = vand.u32 2147483647, %v454_v50  ;;  %v608_v43 = vsel %vm342_vm3, %v601_v48, 0.0  ;;  %v612_v36 = vsel %vm342_vm3, %v603_v56, 0.0 }
 0x1a8   : > { %v609_v54 = vadd.f32 %v608_v43, %v607_v51 }
 0x1a9   : > { %v478_v55 = vadd.f32 %v472_v1, %v466_v53 }
 0x1aa   : > { %v611_v58 = vadd.f32 %v610_v57, %v609_v54 }
 0x1ab   : > { %v598_v59 = vsub.f32 %v478_v55, %v592_v52 }
 0x1ac   : > { %v613_v62 = vadd.f32 %v612_v36, %v611_v58 }
 0x1ad   : > { %v604_v60 = vand.u32 2147483647, %v598_v59 }
 0x1af   : > { %v614_v5 = vsel %vm342_vm3, %v604_v60, 0.0 }
 0x1b0   : > { %v615_v8 = vadd.f32 %v614_v5, %v613_v62 }
 0x1b2   : > { %616 = vadd.xlane.f32.xlu1 %v615_v8 }
 0x1c6   : > { %v355_v9 = vpop.xlane.xlu0 %354 }
 0x1c7   : > { %v356_v13 = vrot.slane %v355_v9, 4 }
 0x1c9   : > { %v357_v15 = vadd.f32 %v356_v13, %v355_v9 }
 0x1cb   : > { %v358_v16 = vrot.slane %v357_v15, 2 }
 0x1cd   : > { %v359_v19 = vadd.f32 %v358_v16, %v357_v15 }
 0x1cf   : > { %v360_v20 = vrot.slane %v359_v19, 1 }
 0x1d1   : > { %v361_v17 = vadd.f32 %v360_v20, %v359_v19 }
 0x1d3   : > { %816 = vpush %v361_v17 }
 0x204   : > { %s817_s28 = spop %816 }
 0x205   : > { %v625_v6 = vstv %s817_s28 }
 0x206   : > { %626 = vst [vmem:[%s208_s21] sm:$0xff] %v625_v6 }
 0x225   : > { %v617_v22 = vpop.xlane.xlu1 %616 }
 0x226   : > { %v618_v23 = vrot.slane %v617_v22, 4 }
 0x228   : > { %v619_v24 = vadd.f32 %v618_v23, %v617_v22 }
 0x22a   : > { %v620_v25 = vrot.slane %v619_v24, 2 }
 0x22c   : > { %v621_v14 = vadd.f32 %v620_v25, %v619_v24 }
 0x22e   : > { %v622_v28 = vrot.slane %v621_v14, 1 }
 0x230   : > { %v623_v29 = vadd.f32 %v622_v28, %v621_v14 }
 0x232   : > { %818 = vpush %v623_v29 }
 0x233   : > { %925 = shalt.err (!%p922_p7)
}
 0x234   : > { %820 = dma.vmem_to_hbm [thread:$0]  (%p1099_p3), %s650_s24, 128, %s652_s27, %s630_s15  }
 0x235   : > { %s663_s28 = scalar_lea.hbm %s1473_s3, %s808_s8  ;;  %s215_s0 = scalar_lea.vmem [#allocation4], %s801_s9 }
 0x236   : > { %s665_s4 = sshll.u32 %s215_s0, 4  ;;  %s667_s5 = sshll.u32 %s663_s28, 4  ;;  %s666_s4 = int_to_ptr.vmem [resolvable:$true] %s665_s4  ;;  %s668_s5 = int_to_ptr.hbm [resolvable:$true] %s667_s5 }
 0x237   : > { %s635_s16 = scalar_lea.sflag [#allocation5], %s1411_s7  ;;  %s940_s29 = sshra.s32 %s668_s5, 4  ;;  %s941_s29 = int_to_ptr.hbm [resolvable:$true] %s940_s29 }
 0x238   : > { %s942_s6 = scalar_lea.hbm %s941_s29, 8  ;;  %s946_s8 = scalar_lea.hbm %s1473_s3, 64 }
 0x239   : > { %p943_p9 = scmp.ne.s32.totalorder %s941_s29, %s942_s6  ;;  %p947_p12 = scmp.lt.s32.totalorder %s941_s29, %s1473_s3 }
 0x23a   : > { %p948_p13 = scmp.lt.s32.totalorder %s946_s8, %s942_s6 }
 0x23b   : > { %p944_p10 = pnand %p943_p9, %p1099_p3 }
 0x23c   : > { %p949_p0 = por %p948_p13, %p947_p12 }
 0x23d   : > { %p945_p11 = pneg %p944_p10 }
 0x23f   : > { %p950_p1 = pnand %p949_p0, %p945_p11 }
 0x263   : > { %s819_s1 = spop %818 }
 0x264   : > { %v627_v30 = vstv %s819_s1 }
 0x265   : > { %628 = vst [vmem:[%s215_s0] sm:$0xff] %v627_v30 }
 0x266   : > { %953 = shalt.err (!%p950_p1)
}
 0x267   : > { %821 = dma.vmem_to_hbm [thread:$0]  (%p1099_p3), %s666_s4, 128, %s668_s5, %s635_s16  }
 0x268 PF: > { %p831_p2 = scmp.ge.s32.totalorder %s1024_s19, 2  ;;  %s679_s0 = sand.u32 1, %s996_s12  }
 0x269   : > { %s680_s1 = scalar_lea.sflag [#allocation3], %s679_s0 }
 0x26a   : > { %p825_p4 = pnand %p831_p2, %p1108_p8 }
 0x26c   : > { %p826_p5 = pneg %p825_p4 }
 0x26e   : > { %987 = dma.done.wait (%p826_p5), %s680_s1, 128  }
 0x26f   : > { %989 = vsyncadd (%p826_p5), %s680_s1, 4294967168  ;;  %s690_s7 = scalar_lea.sflag [#allocation5], %s679_s0 }
 0x270   : > { %991 = dma.done.wait (%p826_p5), %s690_s7, 128  }
 0x271   : > { %993 = vsyncadd (%p826_p5), %s690_s7, 4294967168  ;;  %s20_s19 = sadd.s32 1, %s1024_s19   ;;  %s1486_s12 = smov %s1000_s13 }
 0x272   : > { %p17_p6 = scmp.ge.s32.totalorder %s20_s19, 10   ;;  %s1487_s13 = smov %s1004_s14 }
 0x273   : > { %s1488_s14 = smov %s1117_s30  ;;  %s1489_s15 = smov %s1016_s17 }
 0x274   : > { %s1490_s16 = smov %s1020_s18  ;;  %s1491_s17 = smov %s1494_s22 }
 0x275   : > { %s1492_s18 = smov %s1498_s23  ;;  %19 = sbr.rel (!%p17_p6) target bundleno = 10 (0xa), region = 83 }
 0x27a   :  { %696 = vsyncpa [#allocation3], 1 }
 0x27b   :  { %698 = vsyncpa [#allocation3 + $0x1], 1 }
 0x27c   :  { %699 = vsyncpa [#allocation5], 1 }
 0x27d   :  { %701 = vsyncpa [#allocation5 + $0x1], 1 }

</bundles_post_ra>
